<compile_context>
chip_gen: v6e
topology: v6e:2x2x1
jax: 0.10.0
libtpu: 0.0.40
codegen_flags: <defaults>
</compile_context>

<pallas_src>
import functools

import jax
import jax.numpy as jnp
from jax.experimental import pallas as pl
from jax.experimental.pallas import tpu as pltpu

_EPS = 1e-5  # nn.InstanceNorm1d default eps


def _query_compositor_kernel(p_ref, t_ref, o_ref, *, inv_L, T, inv_Tm1):
    # p_ref: (B, C, L), t_ref: (B, T, L), o_ref: (B, C, L) VMEM tiles.
    p = p_ref[...].astype(jnp.float32)  # (B, C, L)
    t = t_ref[...].astype(jnp.float32)  # (B, T, L)

    # --- InstanceNorm1d stats over L (lane axis), biased variance, no affine ---
    s1 = jnp.sum(p, axis=-1, keepdims=True)          # (B, C, 1)
    s2 = jnp.sum(p * p, axis=-1, keepdims=True)      # (B, C, 1)
    mean_p = s1 * inv_L
    var_p = jnp.maximum(s2 * inv_L - mean_p * mean_p, 0.0)   # clamp vs. cancellation
    inv_std_p = jax.lax.rsqrt(var_p + _EPS)           # EUP rsqrt (free slot)

    # --- torch.std_mean(text, dim=1, keepdim=True): mean + UNBIASED std over T ---
    t1 = jnp.sum(t, axis=1, keepdims=True)            # (B, 1, L)
    t2 = jnp.sum(t * t, axis=1, keepdims=True)        # (B, 1, L)
    mean_t = t1 * (1.0 / T)
    var_t = jnp.maximum((t2 - T * (mean_t * mean_t)) * inv_Tm1, 0.0)
    std_t = jnp.sqrt(var_t)                           # (B, 1, L)

    # --- fused modulation: std_text * normalized + mean_text (broadcast over C) ---
    o_ref[...] = ((p - mean_p) * inv_std_p * std_t + mean_t).astype(o_ref.dtype)


def query_compositor(point_features, text_features,
                     *, vmem_budget_bytes=36 * 1024 * 1024):
    """point_features: (N, C, L); text_features: (N, T, L) -> (N, C, L)."""
    N, C, L = point_features.shape
    Nt, T, Lt = text_features.shape
    assert Nt == N and Lt == L
    # torch.std_mean with ddof=1 over a size-1 dim yields NaN; guard explicitly.
    assert T > 1, "text_features must have more than one token along dim=1"

    itemsize = jnp.dtype(point_features.dtype).itemsize
    # Per batch element per step:
    #   double-buffered I/O tiles: 2 * (point in + text in + point out)
    per_n_io = 2 * L * (2 * C + T) * itemsize
    # f32 elementwise temporaries Mosaic may materialize in VMEM (p, p*p, fused output
    # chain for point; t, t*t for text) — conservative estimate.
    per_n_tmp = 4 * L * (4 * C + 2 * T)
    B = max(1, vmem_budget_bytes // (per_n_io + per_n_tmp))
    B = min(B, N)
    if N > 1:
        # Keep at least 2 grid iterations so v7x's two TensorCores both get work.
        B = min(B, pl.cdiv(N, 2))
    grid_n = pl.cdiv(N, B)

    kernel = functools.partial(
        _query_compositor_kernel,
        inv_L=1.0 / L, T=float(T), inv_Tm1=1.0 / (T - 1),
    )

    return pl.pallas_call(
        kernel,
        out_shape=jax.ShapeDtypeStruct((N, C, L), point_features.dtype),
        grid_spec=pltpu.PrefetchScalarGridSpec(
            num_scalar_prefetch=0,
            grid=(grid_n,),
            in_specs=[
                pl.BlockSpec((B, C, L), lambda n: (n, 0, 0)),
                pl.BlockSpec((B, T, L), lambda n: (n, 0, 0)),
            ],
            out_specs=pl.BlockSpec((B, C, L), lambda n: (n, 0, 0)),
        ),
        compiler_params=pltpu.CompilerParams(
            dimension_semantics=("parallel",),
            # Above v5e's 16 MiB / v6e's 32 MiB scoped defaults, below v7x's 64 MiB
            # physical VMEM; B sizing above leaves headroom for compiler temporaries.
            vmem_limit_bytes=48 * 1024 * 1024,
        ),
    )(point_features, text_features)


if __name__ == "__main__":
    # Small shapes consistent with the module (scaled-down feature_size / text_feat_dim).
    N, C, L, T = 4, 64, 256, 8  # batch, feature_size, length, text_feat_dim

    key = jax.random.PRNGKey(0)
    kp, kt = jax.random.split(key)
    point_features = jax.random.normal(kp, (N, C, L), dtype=jnp.float32)
    text_features = jax.random.normal(kt, (N, T, L), dtype=jnp.float32)

    out = jax.block_until_ready(query_compositor(point_features, text_features))

    # Pure-JAX reference (same semantics as the PyTorch forward).
    mean_p = jnp.mean(point_features, axis=2, keepdims=True)
    var_p = jnp.mean((point_features - mean_p) ** 2, axis=2, keepdims=True)
    norm_p = (point_features - mean_p) / jnp.sqrt(var_p + _EPS)
    mean_t = jnp.mean(text_features, axis=1, keepdims=True)
    std_t = jnp.std(text_features, axis=1, keepdims=True, ddof=1)
    ref = std_t * norm_p + mean_t
    assert jnp.allclose(out, ref, atol=1e-4, rtol=1e-4), "mismatch vs reference"

    print("KERNEL_OK")
</pallas_src>

<mosaic_0001>
module attributes {stable_mosaic.version = 11 : i64} {
  func.func @_query_compositor_kernel(%arg0: i32, %arg1: memref<2x64x256xf32, #tpu.memory_space<vmem>>, %arg2: memref<2x8x256xf32, #tpu.memory_space<vmem>>, %arg3: memref<2x64x256xf32, #tpu.memory_space<vmem>>) attributes {dimension_semantics = [#tpu.dimension_semantics<parallel>], iteration_bounds = array<i64: 2>, scalar_prefetch = 0 : i64, scratch_operands = 0 : i64, tpu.core_type = #tpu.core_type<tc>, window_params = [{transform_indices = @transform_0, window_bounds = array<i64: 2, 64, 256>}, {transform_indices = @transform_1, window_bounds = array<i64: 2, 8, 256>}, {transform_indices = @transform_2, window_bounds = array<i64: 2, 64, 256>}]} {
    %c0 = arith.constant 0 : index
    %c0_0 = arith.constant 0 : index
    %c0_1 = arith.constant 0 : index
    %0 = vector.load %arg1[%c0, %c0_0, %c0_1] : memref<2x64x256xf32, #tpu.memory_space<vmem>>, vector<2x64x256xf32>
    %c0_2 = arith.constant 0 : index
    %c0_3 = arith.constant 0 : index
    %c0_4 = arith.constant 0 : index
    %1 = vector.load %arg2[%c0_2, %c0_3, %c0_4] : memref<2x8x256xf32, #tpu.memory_space<vmem>>, vector<2x8x256xf32>
    %cst = arith.constant dense<0.000000e+00> : vector<2x64xf32>
    %2 = vector.multi_reduction <add>, %0, %cst [2] : vector<2x64x256xf32> to vector<2x64xf32>
    %3 = vector.shape_cast %2 : vector<2x64xf32> to vector<2x64x1xf32>
    %4 = arith.mulf %0, %0 : vector<2x64x256xf32>
    %cst_5 = arith.constant dense<0.000000e+00> : vector<2x64xf32>
    %5 = vector.multi_reduction <add>, %4, %cst_5 [2] : vector<2x64x256xf32> to vector<2x64xf32>
    %6 = vector.shape_cast %5 : vector<2x64xf32> to vector<2x64x1xf32>
    %cst_6 = arith.constant 3.906250e-03 : f32
    %7 = vector.broadcast %cst_6 : f32 to vector<2x64x1xf32>
    %8 = arith.mulf %3, %7 : vector<2x64x1xf32>
    %cst_7 = arith.constant 3.906250e-03 : f32
    %9 = vector.broadcast %cst_7 : f32 to vector<2x64x1xf32>
    %10 = arith.mulf %6, %9 : vector<2x64x1xf32>
    %11 = arith.mulf %8, %8 : vector<2x64x1xf32>
    %12 = arith.subf %10, %11 : vector<2x64x1xf32>
    %cst_8 = arith.constant 0.000000e+00 : f32
    %13 = vector.broadcast %cst_8 : f32 to vector<2x64x1xf32>
    %14 = arith.maximumf %12, %13 : vector<2x64x1xf32>
    %cst_9 = arith.constant 9.99999974E-6 : f32
    %15 = vector.broadcast %cst_9 : f32 to vector<2x64x1xf32>
    %16 = arith.addf %14, %15 : vector<2x64x1xf32>
    %17 = math.rsqrt %16 : vector<2x64x1xf32>
    %cst_10 = arith.constant dense<0.000000e+00> : vector<2x256xf32>
    %18 = vector.multi_reduction <add>, %1, %cst_10 [1] : vector<2x8x256xf32> to vector<2x256xf32>
    %19 = vector.shape_cast %18 : vector<2x256xf32> to vector<2x1x256xf32>
    %20 = arith.mulf %1, %1 : vector<2x8x256xf32>
    %cst_11 = arith.constant dense<0.000000e+00> : vector<2x256xf32>
    %21 = vector.multi_reduction <add>, %20, %cst_11 [1] : vector<2x8x256xf32> to vector<2x256xf32>
    %22 = vector.shape_cast %21 : vector<2x256xf32> to vector<2x1x256xf32>
    %cst_12 = arith.constant 1.250000e-01 : f32
    %23 = vector.broadcast %cst_12 : f32 to vector<2x1x256xf32>
    %24 = arith.mulf %19, %23 : vector<2x1x256xf32>
    %25 = arith.mulf %24, %24 : vector<2x1x256xf32>
    %cst_13 = arith.constant 8.000000e+00 : f32
    %26 = vector.broadcast %cst_13 : f32 to vector<2x1x256xf32>
    %27 = arith.mulf %26, %25 : vector<2x1x256xf32>
    %28 = arith.subf %22, %27 : vector<2x1x256xf32>
    %cst_14 = arith.constant 0.142857149 : f32
    %29 = vector.broadcast %cst_14 : f32 to vector<2x1x256xf32>
    %30 = arith.mulf %28, %29 : vector<2x1x256xf32>
    %cst_15 = arith.constant 0.000000e+00 : f32
    %31 = vector.broadcast %cst_15 : f32 to vector<2x1x256xf32>
    %32 = arith.maximumf %30, %31 : vector<2x1x256xf32>
    %33 = math.sqrt %32 : vector<2x1x256xf32>
    %34 = vector.broadcast %8 : vector<2x64x1xf32> to vector<2x64x256xf32>
    %35 = arith.subf %0, %34 : vector<2x64x256xf32>
    %36 = vector.broadcast %17 : vector<2x64x1xf32> to vector<2x64x256xf32>
    %37 = arith.mulf %35, %36 : vector<2x64x256xf32>
    %38 = vector.broadcast %33 : vector<2x1x256xf32> to vector<2x64x256xf32>
    %39 = arith.mulf %37, %38 : vector<2x64x256xf32>
    %40 = vector.broadcast %24 : vector<2x1x256xf32> to vector<2x64x256xf32>
    %41 = arith.addf %39, %40 : vector<2x64x256xf32>
    %c0_16 = arith.constant 0 : index
    %c0_17 = arith.constant 0 : index
    %c0_18 = arith.constant 0 : index
    %42 = vector.load %arg3[%c0_16, %c0_17, %c0_18] : memref<2x64x256xf32, #tpu.memory_space<vmem>>, vector<2x64x256xf32>
    tpu.vector_store %arg3[%c0_16, %c0_17, %c0_18], %41 {strides = array<i32>} : memref<2x64x256xf32, #tpu.memory_space<vmem>>, vector<2x64x256xf32>,
    return
  }
  func.func @transform_0(%arg0: i32) -> (i32, i32, i32) {
    %c0_i32 = arith.constant 0 : i32
    %c0_i32_0 = arith.constant 0 : i32
    %c0_i32_1 = arith.constant 0 : i32
    return %arg0, %c0_i32, %c0_i32_0 : i32, i32, i32
  }
  func.func @transform_1(%arg0: i32) -> (i32, i32, i32) {
    %c0_i32 = arith.constant 0 : i32
    %c0_i32_0 = arith.constant 0 : i32
    %c0_i32_1 = arith.constant 0 : i32
    return %arg0, %c0_i32, %c0_i32_0 : i32, i32, i32
  }
  func.func @transform_2(%arg0: i32) -> (i32, i32, i32) {
    %c0_i32 = arith.constant 0 : i32
    %c0_i32_0 = arith.constant 0 : i32
    %c0_i32_1 = arith.constant 0 : i32
    return %arg0, %c0_i32, %c0_i32_0 : i32, i32, i32
  }
}

</mosaic_0001>

<bundles_post_ra>
// kernel: tpu_custom_call.1
= control target key start
LH: loop header
LB: loop body
LE: loop exit
PB: predicated region body
PF: predicated region fallthrough
CT: control target
= control target key end

     0   :  { %7 = vsyncpa [#allocation3], 0  ;;  %s1897_s0 = inlined_call_operand.hbm [shape: f32[4,64,256], index: 0, kind: input, shape index: {}]   ;;  %s1898_s1 = inlined_call_operand.hbm [shape: f32[4,8,256], index: 1, kind: input, shape index: {}]   ;;  %s1899_s2 = inlined_call_operand.hbm [shape: f32[4,64,256], index: 2, kind: output, shape index: {}]  }
   0x1   :  { %9 = vsyncpa [#allocation3 + $0x1], 0 }
   0x2   :  { %10 = vsyncpa [#allocation6], 0 }
   0x3   :  { %12 = vsyncpa [#allocation6 + $0x1], 0 }
   0x4   :  { %13 = vsyncpa [#allocation4], 0 }
   0x5   :  { %15 = vsyncpa [#allocation4 + $0x1], 0  ;;  %s1128_s9 = smov 0   ;;  %s1130_s10 = smov 0  }
   0x6   :  { %s1132_s11 = smov 0   ;;  %s1134_s12 = smov 0  }
   0x7 LB: > { %s1149_s13 = sadd.s32 4294967295, %s1104_s12   ;;  %s858_s14 = sadd.s32 4294967294, %s1104_s12   ;;  %s1104_s12 = sphi %s1134_s12, %s1991_s12   ;;  %s1100_s11 = sphi %s1132_s11, %s1990_s11   ;;  %s1096_s10 = sphi %s1130_s10, %s1989_s10   ;;  %s1092_s9 = sphi %s1128_s9, %s1988_s9  }
   0x8   : > { %s1153_s15 = sadd.s32 1, %s1104_s12   ;;  %s28_s16 = sadd.s32 1, %s1100_s11 }
   0x9   : > { %s25_s17 = ssub.s32 %s1104_s12, %s1153_s15  ;;  %p35_p0 = scmp.ne.s32.totalorder %s1100_s11, %s1096_s10 }
   0xa   : > { %p26_p1 = scmp.eq.s32.totalorder %s25_s17, 0  ;;  %p36_p2 = scmp.eq.s32.totalorder %s1104_s12, 0 }
   0xb   : > { %p41_p3 = scmp.ne.s32.totalorder %s1096_s10, %s1092_s9  ;;  %p42_p4 = scmp.eq.s32.totalorder %s1149_s13, 0 }
   0xc   : > { %s1165_s18 = scalar_select %p26_p1, %s1100_s11, %s28_s16  }
   0xd   : > { %p1167_p5 = por %p36_p2, %p35_p0  ;;  %p1171_p6 = por %p42_p4, %p41_p3 }
   0xe   : > { %p91_p7 = scmp.eq.s32.totalorder %s1149_s13, 1  ;;  %p97_p8 = scmp.eq.s32.totalorder %s858_s14, 1 }
   0xf   : > { %s1925_s20 = scalar_select %p1171_p6, 1, 0 }
  0x10   : > { %p902_p10 = scmp.lt.s32.totalorder %s1104_s12, 2  ;;  %p1178_p11 = por %p91_p7, %p35_p0 }
  0x11   : > { %p1182_p12 = por %p97_p8, %p41_p3  ;;  %s1187_s23 = sand.u32 1, %s1100_s11  }
  0x12   : > { %s1926_s21 = scalar_select %p1178_p11, 1, 0 }
  0x13   : > { %s1927_s22 = scalar_select %p1182_p12, 1, 0 }
  0x14   : > { %s880_s24 = sshll.u32 %s1104_s12, 12  ;;  %s861_s25 = sshll.u32 %s1187_s23, 8 }
  0x15   : > { %s1194_s28 = scalar_lea.hbm %s1897_s0, %s880_s24  ;;  %s121_s29 = scalar_lea.vmem [#allocation2], %s861_s25 }
  0x16   : > { %s129_s30 = sshll.u32 %s121_s29, 4  ;;  %p1198_p13 = pnand %p902_p10, %p1167_p5  ;;  %s1202_s30 = int_to_ptr.vmem [resolvable:$true] %s129_s30 }
  0x17   : > { %s118_s4 = scalar_lea.sflag [#allocation3], %s1187_s23  ;;  %s980_s5 = scalar_lea.hbm %s1194_s28, 4096 }
  0x18   : > { %p981_p0 = scmp.ne.s32.totalorder %s1194_s28, %s980_s5  ;;  %p982_p1 = pneg %p1198_p13 }
  0x19   : > { %s985_s8 = scalar_lea.hbm %s1897_s0, 8192  ;;  %p986_p4 = scmp.lt.s32.totalorder %s1194_s28, %s1897_s0 }
  0x1a   : > { %p983_p2 = pnand %p982_p1, %p981_p0  ;;  %p987_p5 = scmp.lt.s32.totalorder %s985_s8, %s980_s5 }
  0x1c   : > { %p984_p3 = pneg %p983_p2  ;;  %p988_p7 = por %p987_p5, %p986_p4 }
  0x1e   : > { %p989_p8 = pnand %p988_p7, %p984_p3 }
  0x20   : > { %992 = shalt.err (!%p989_p8)
}
  0x21   : > { %s993_s17 = scalar_lea.vmem %s1202_s30, 4096  ;;  %s1106_s19 = smov [#allocation2]  }
  0x22   : > { %p994_p10 = scmp.ne.s32.totalorder %s1202_s30, %s993_s17  ;;  %s998_s24 = sshll.u32 %s1106_s19, 4  ;;  %s999_s24 = int_to_ptr.vmem [resolvable:$false] %s998_s24 }
  0x23   : > { %s1000_s25 = scalar_lea.vmem %s999_s24, 8192  ;;  %p1001_p9 = scmp.lt.s32.totalorder %s1202_s30, %s999_s24 }
  0x24   : > { %p996_p0 = pnand %p994_p10, %p982_p1  ;;  %p1002_p12 = scmp.lt.s32.totalorder %s1000_s25, %s993_s17 }
  0x26   : > { %p997_p2 = pneg %p996_p0  ;;  %p1003_p11 = por %p1002_p12, %p1001_p9 }
  0x28   : > { %p1004_p4 = pnand %p1003_p11, %p997_p2 }
  0x2a   : > { %1007 = shalt.err (!%p1004_p4)
}
  0x2b   : > { %s1107_s26 = smov 256   ;;  %s1108_s27 = smov 16  }
  0x2c   : > { %894 = dma.hbm_to_vmem [thread:$0]  (!%p1198_p13), %s1194_s28, 4096, %s1202_s30, %s118_s4, %s1107_s26, %s1107_s26, %s1108_s27  }
  0x2d   : > { %p869_p9 = scmp.ge.s32.totalorder %s1104_s12, 1  ;;  %p159_p11 = scmp.lt.s32.totalorder %s1104_s12, 3 }
  0x2e   : > { %s865_s29 = sshll.u32 %s1187_s23, 5  ;;  %s882_s6 = sshll.u32 %s1104_s12, 9 }
  0x2f   : > { %p1237_p12 = pnand %p869_p9, %p159_p11  ;;  %s143_s7 = scalar_lea.vmem [#allocation5], %s865_s29 }
  0x30   : > { %s151_s8 = sshll.u32 %s143_s7, 4  ;;  %s1245_s17 = scalar_lea.hbm %s1898_s1, %s882_s6  ;;  %s1247_s8 = int_to_ptr.vmem [resolvable:$true] %s151_s8 }
  0x31   : > { %s140_s28 = scalar_lea.sflag [#allocation6], %s1187_s23  ;;  %s1008_s30 = scalar_lea.hbm %s1245_s17, 512 }
  0x32   : > { %p1009_p3 = scmp.ne.s32.totalorder %s1245_s17, %s1008_s30  ;;  %s1013_s24 = scalar_lea.hbm %s1898_s1, 1024 }
  0x33   : > { %p1014_p8 = scmp.lt.s32.totalorder %s1245_s17, %s1898_s1  ;;  %p1015_p10 = scmp.lt.s32.totalorder %s1013_s24, %s1008_s30 }
  0x34   : > { %p1011_p5 = pnand %p1009_p3, %p982_p1 }
  0x35   : > { %p1016_p0 = por %p1015_p10, %p1014_p8 }
  0x36   : > { %p1012_p7 = pneg %p1011_p5 }
  0x38   : > { %p1017_p2 = pnand %p1016_p0, %p1012_p7 }
  0x3a   : > { %1020 = shalt.err (!%p1017_p2)
}
  0x3b   : > { %s1021_s23 = scalar_lea.vmem %s1247_s8, 512  ;;  %s1109_s6 = smov [#allocation5]  }
  0x3c   : > { %p1022_p4 = scmp.ne.s32.totalorder %s1247_s8, %s1021_s23  ;;  %s1026_s7 = sshll.u32 %s1109_s6, 4  ;;  %s1027_s7 = int_to_ptr.vmem [resolvable:$false] %s1026_s7 }
  0x3d   : > { %s1028_s14 = scalar_lea.vmem %s1027_s7, 1024  ;;  %p1029_p3 = scmp.lt.s32.totalorder %s1247_s8, %s1027_s7 }
  0x3e   : > { %p1024_p9 = pnand %p1022_p4, %p982_p1  ;;  %p1030_p5 = scmp.lt.s32.totalorder %s1028_s14, %s1021_s23 }
  0x40   : > { %p1025_p11 = pneg %p1024_p9  ;;  %p1031_p6 = por %p1030_p5, %p1029_p3 }
  0x42   : > { %p1032_p8 = pnand %p1031_p6, %p1025_p11 }
  0x44   : > { %1035 = shalt.err (!%p1032_p8)
}
  0x45   : > { %897 = dma.hbm_to_vmem [thread:$0]  (!%p1198_p13), %s1245_s17, 512, %s1247_s8, %s140_s28, %s1107_s26, %s1107_s26, %s1108_s27  }
  0x46   : > { %163 = sbr.rel (%p1237_p12) target bundleno = 341 (0x155), region = 28 }
  0x4b   : > { %s1278_s16 = sand.u32 1, %s1096_s10   ;;  %p1930_p6 = scmp.ne.s32.totalorder %s1925_s20, 0 }
  0x4c   : > { %s870_s30 = sshll.u32 %s1278_s16, 8  ;;  %s166_s4 = scalar_lea.sflag [#allocation3], %s1278_s16 }
  0x4d   : > { %s1284_s3 = scalar_lea.vmem [#allocation2], %s870_s30 }
  0x4e   : > { %1079 = dma.done.wait (%p1930_p6), %s166_s4, 4096  }
  0x4f   : > { %1081 = vsyncadd (%p1930_p6), %s166_s4, 4294963200  ;;  %s871_s26 = sshll.u32 %s1278_s16, 5  ;;  %s175_s27 = scalar_lea.sflag [#allocation6], %s1278_s16 }
  0x50   : > { %s1292_s5 = scalar_lea.vmem [#allocation5], %s871_s26 }
  0x51   : > { %1083 = dma.done.wait (%p1930_p6), %s175_s27, 512  }
  0x52   : > { %1085 = vsyncadd (%p1930_p6), %s175_s27, 4294966784  ;;  %v1299_v0 = vld [vmem:[%s1284_s3 + $0x20] sm:$0xff]  ;;  %v1302_v1 = vld [vmem:[%s1284_s3 + $0x28] sm:$0xff]  ;;  %s1693_s20 = scalar_lea.vmem [#allocation7], %s870_s30  ;;  %s884_s8 = sshll.u32 %s1149_s13, 12 }
  0x53   : > { %v1305_v2 = vld [vmem:[%s1284_s3] sm:$0xff]  ;;  %v249_v3 = vadd.f32 %v1302_v1, %v1299_v0  ;;  %v1310_v4 = vld [vmem:[%s1284_s3 + $0x8] sm:$0xff]  ;;  %v1313_v5 = vld [vmem:[%s1284_s3 + $0x30] sm:$0xff]  ;;  %v295_v56 = vmul.f32 %v1299_v0, %v1299_v0  ;;  %v296_v57 = vmul.f32 %v1302_v1, %v1302_v1  ;;  %s762_s17 = sshll.u32 %s1693_s20, 4  ;;  %s1846_s19 = scalar_lea.hbm %s1899_s2, %s884_s8  ;;  %s1848_s17 = int_to_ptr.vmem [resolvable:$true] %s762_s17 }
  0x54   : > { %v1316_v6 = vld [vmem:[%s1284_s3 + $0x38] sm:$0xff]  ;;  %v243_v7 = vadd.f32 %v1310_v4, %v1305_v2  ;;  %v1321_v8 = vld [vmem:[%s1284_s3 + $0x10] sm:$0xff]  ;;  %v1337_v14 = vld [vmem:[%s1284_s3 + $0x40] sm:$0xff]  ;;  %v291_v50 = vmul.f32 %v1305_v2, %v1305_v2  ;;  %v292_v51 = vmul.f32 %v1310_v4, %v1310_v4  ;;  %v297_v53 = vmul.f32 %v1313_v5, %v1313_v5  ;;  %s748_s24 = scalar_lea.sflag [#allocation4], %s1278_s16  ;;  %s1036_s25 = scalar_lea.vmem %s1848_s17, 4096 }
  0x55   : > { %v1324_v9 = vld [vmem:[%s1284_s3 + $0x18] sm:$0xff]  ;;  %250 = vadd.xlane.f32.xlu1 %v249_v3  ;;  %v252_v10 = vadd.f32 %v1316_v6, %v1313_v5  ;;  %v1331_v12 = vld [vmem:[%s1284_s3 + $0x50] sm:$0xff]  ;;  %v1340_v15 = vld [vmem:[%s1284_s3 + $0x48] sm:$0xff]  ;;  %v293_v47 = vmul.f32 %v1321_v8, %v1321_v8  ;;  %v298_v54 = vmul.f32 %v1316_v6, %v1316_v6  ;;  %v329_v61 = vadd.f32 %v296_v57, %v295_v56  ;;  %p1037_p13 = scmp.ne.s32.totalorder %s1848_s17, %s1036_s25  ;;  %p1985_p1 = scmp.ne.s32.totalorder %s1926_s21, 0 }
  0x56   : > { %244 = vadd.xlane.f32.xlu0 %v243_v7  ;;  %v246_v11 = vadd.f32 %v1324_v9, %v1321_v8  ;;  %v1334_v13 = vld [vmem:[%s1284_s3 + $0x58] sm:$0xff]  ;;  %v255_v17 = vadd.f32 %v1340_v15, %v1337_v14  ;;  %v1347_v18 = vld [vmem:[%s1284_s3 + $0x70] sm:$0xff]  ;;  %v1353_v20 = vld [vmem:[%s1284_s3 + $0x60] sm:$0xff]  ;;  %v294_v48 = vmul.f32 %v1324_v9, %v1324_v9  ;;  %v323_v55 = vadd.f32 %v292_v51, %v291_v50  ;;  %s1110_s29 = smov [#allocation7]  }
  0x57   : > { %v258_v16 = vadd.f32 %v1334_v13, %v1331_v12  ;;  %v1350_v19 = vld [vmem:[%s1284_s3 + $0x78] sm:$0xff]  ;;  %v1356_v21 = vld [vmem:[%s1284_s3 + $0x68] sm:$0xff]  ;;  %v1363_v24 = vld [vmem:[%s1284_s3 + $0x90] sm:$0xff]  ;;  %v332_v58 = vadd.f32 %v298_v54, %v297_v53  ;;  %v301_v59 = vmul.f32 %v1331_v12, %v1331_v12  ;;  %v302_v60 = vmul.f32 %v1334_v13, %v1334_v13  ;;  %p1038_p12 = pnand %p1037_p13, %p1985_p1  ;;  %s1040_s23 = sshll.u32 %s1110_s29, 4  ;;  %s1041_s23 = int_to_ptr.vmem [resolvable:$false] %s1040_s23 }
  0x58   : > { %v264_v22 = vadd.f32 %v1350_v19, %v1347_v18  ;;  %v261_v23 = vadd.f32 %v1356_v21, %v1353_v20  ;;  %v1366_v25 = vld [vmem:[%s1284_s3 + $0x98] sm:$0xff]  ;;  %v1369_v26 = vld [vmem:[%s1284_s3 + $0x80] sm:$0xff]  ;;  %v1372_v27 = vld [vmem:[%s1284_s3 + $0x88] sm:$0xff]  ;;  %v326_v52 = vadd.f32 %v294_v48, %v293_v47  ;;  %v299_v62 = vmul.f32 %v1337_v14, %v1337_v14  ;;  %s1042_s6 = scalar_lea.vmem %s1041_s23, 8192  ;;  %p1043_p10 = scmp.lt.s32.totalorder %s1848_s17, %s1041_s23 }
  0x59   : > { %253 = vadd.xlane.f32.xlu1 %v252_v10  ;;  %v270_v28 = vadd.f32 %v1366_v25, %v1363_v24  ;;  %v267_v29 = vadd.f32 %v1372_v27, %v1369_v26  ;;  %v1379_v30 = vld [vmem:[%s1284_s3 + $0xb0] sm:$0xff]  ;;  %v1382_v31 = vld [vmem:[%s1284_s3 + $0xb8] sm:$0xff]  ;;  %v1385_v32 = vld [vmem:[%s1284_s3 + $0xa0] sm:$0xff]  ;;  %v300_v63 = vmul.f32 %v1340_v15, %v1340_v15  ;;  %v338_v3 = vadd.f32 %v302_v60, %v301_v59  ;;  %p1039_p7 = pneg %p1038_p12  ;;  %p1044_p0 = scmp.lt.s32.totalorder %s1042_s6, %s1036_s25 }
  0x5a   : > { %247 = vadd.xlane.f32.xlu0 %v246_v11  ;;  %1931 = vst [vmem:[#allocation11_spill] sm:$0xff] %v1379_v30  ;;  %1932 = vst [vmem:[#allocation12_spill] sm:$0xff] %v1382_v31  ;;  %v1388_v33 = vld [vmem:[%s1284_s3 + $0xa8] sm:$0xff]  ;;  %v276_v34 = vadd.f32 %v1382_v31, %v1379_v30  ;;  %v1395_v36 = vld [vmem:[%s1284_s3 + $0xd0] sm:$0xff]  ;;  %v305_v7 = vmul.f32 %v1347_v18, %v1347_v18  ;;  %v306_v10 = vmul.f32 %v1350_v19, %v1350_v19 }
  0x5b   : > { %1933 = vst [vmem:[#allocation13_spill] sm:$0xff] %v1385_v32  ;;  %1934 = vst [vmem:[#allocation14_spill] sm:$0xff] %v1388_v33  ;;  %v273_v35 = vadd.f32 %v1388_v33, %v1385_v32  ;;  %v1398_v37 = vld [vmem:[%s1284_s3 + $0xd8] sm:$0xff]  ;;  %v1401_v38 = vld [vmem:[%s1284_s3 + $0xc0] sm:$0xff]  ;;  %v335_v11 = vadd.f32 %v300_v63, %v299_v62  ;;  %v311_v48 = vmul.f32 %v1385_v32, %v1385_v32  ;;  %p1045_p2 = por %p1044_p0, %p1043_p10 }
  0x5c   : > { %1935 = vst [vmem:[#allocation15_spill] sm:$0xff] %v1395_v36  ;;  %1936 = vst [vmem:[#allocation16_spill] sm:$0xff] %v1398_v37  ;;  %v1404_v39 = vld [vmem:[%s1284_s3 + $0xc8] sm:$0xff]  ;;  %v282_v40 = vadd.f32 %v1398_v37, %v1395_v36  ;;  %v1411_v42 = vld [vmem:[%s1284_s3 + $0xf0] sm:$0xff]  ;;  %v317_v51 = vmul.f32 %v1395_v36, %v1395_v36  ;;  %v315_v54 = vmul.f32 %v1401_v38, %v1401_v38 }
  0x5d   : > { %259 = vadd.xlane.f32.xlu1 %v258_v16  ;;  %1937 = vst [vmem:[#allocation17_spill] sm:$0xff] %v1401_v38  ;;  %1938 = vst [vmem:[#allocation18_spill] sm:$0xff] %v1404_v39  ;;  %v279_v41 = vadd.f32 %v1404_v39, %v1401_v38  ;;  %v1414_v43 = vld [vmem:[%s1284_s3 + $0xf8] sm:$0xff]  ;;  %v1417_v44 = vld [vmem:[%s1284_s3 + $0xe0] sm:$0xff]  ;;  %v303_v16 = vmul.f32 %v1353_v20, %v1353_v20  ;;  %v321_v57 = vmul.f32 %v1411_v42, %v1411_v42  ;;  %p1046_p4 = pnand %p1045_p2, %p1039_p7 }
  0x5e   : > { %256 = vadd.xlane.f32.xlu0 %v255_v17  ;;  %1939 = vst [vmem:[#allocation19_spill] sm:$0xff] %v1411_v42  ;;  %1940 = vst [vmem:[#allocation20_spill] sm:$0xff] %v1414_v43  ;;  %v1420_v45 = vld [vmem:[%s1284_s3 + $0xe8] sm:$0xff]  ;;  %v288_v46 = vadd.f32 %v1414_v43, %v1411_v42  ;;  %v304_v17 = vmul.f32 %v1356_v21, %v1356_v21  ;;  %v319_v60 = vmul.f32 %v1417_v44, %v1417_v44 }
  0x5f   : > { %1941 = vst [vmem:[#allocation21_spill] sm:$0xff] %v1417_v44  ;;  %1942 = vst [vmem:[#allocation22_spill] sm:$0xff] %v1420_v45  ;;  %v285_v49 = vadd.f32 %v1420_v45, %v1417_v44 }
  0x61   : > { %265 = vadd.xlane.f32.xlu1 %v264_v22  ;;  %v344_v22 = vadd.f32 %v306_v10, %v305_v7  ;;  %v240_v7 = vld [vmem:[%s1292_s5 + $0x8] sm:$0xff]  ;;  %v241_v10 = vld [vmem:[%s1292_s5 + $0x10] sm:$0xff] }
  0x62   : > { %262 = vadd.xlane.f32.xlu0 %v261_v23  ;;  %v309_v23 = vmul.f32 %v1363_v24, %v1363_v24 }
  0x65   : > { %271 = vadd.xlane.f32.xlu1 %v270_v28  ;;  %v310_v28 = vmul.f32 %v1366_v25, %v1366_v25 }
  0x66   : > { %268 = vadd.xlane.f32.xlu0 %v267_v29  ;;  %v341_v29 = vadd.f32 %v304_v17, %v303_v16  ;;  %v242_v16 = vld [vmem:[%s1292_s5 + $0x18] sm:$0xff]  ;;  %v489_v17 = vrot.slane %v240_v7, 4 }
  0x69   : > { %277 = vadd.xlane.f32.xlu1 %v276_v34  ;;  %v307_v34 = vmul.f32 %v1369_v26, %v1369_v26 }
  0x6a   : > { %274 = vadd.xlane.f32.xlu0 %v273_v35  ;;  %v308_v35 = vmul.f32 %v1372_v27, %v1372_v27 }
  0x6c   : > { %v347_v47 = vadd.f32 %v308_v35, %v307_v34 }
  0x6d   : > { %283 = vadd.xlane.f32.xlu1 %v282_v40  ;;  %v350_v40 = vadd.f32 %v310_v28, %v309_v23  ;;  %v501_v23 = vrot.slane %v242_v16, 4 }
  0x6e   : > { %280 = vadd.xlane.f32.xlu0 %v279_v41  ;;  %v313_v41 = vmul.f32 %v1379_v30, %v1379_v30 }
  0x6f   : > { %v502_v35 = vadd.f32 %v501_v23, %v242_v16 }
  0x71   : > { %289 = vadd.xlane.f32.xlu1 %v288_v46  ;;  %v314_v46 = vmul.f32 %v1382_v31, %v1382_v31 }
  0x72   : > { %286 = vadd.xlane.f32.xlu0 %v285_v49  ;;  %v312_v49 = vmul.f32 %v1388_v33, %v1388_v33 }
  0x73   : > { %v356_v50 = vadd.f32 %v314_v46, %v313_v41 }
  0x74   : > { %v353_v53 = vadd.f32 %v312_v49, %v311_v48  ;;  %v509_v49 = vmul.f32 %v241_v10, %v241_v10 }
  0x75   : > { %327 = vadd.xlane.f32.xlu1 %v326_v52  ;;  %v318_v52 = vmul.f32 %v1398_v37, %v1398_v37 }
  0x76   : > { %324 = vadd.xlane.f32.xlu0 %v323_v55  ;;  %v316_v55 = vmul.f32 %v1404_v39, %v1404_v39 }
  0x77   : > { %v362_v56 = vadd.f32 %v318_v52, %v317_v51  ;;  %v510_v51 = vmul.f32 %v242_v16, %v242_v16 }
  0x78   : > { %v359_v59 = vadd.f32 %v316_v55, %v315_v54 }
  0x79   : > { %333 = vadd.xlane.f32.xlu1 %v332_v58  ;;  %v322_v58 = vmul.f32 %v1414_v43, %v1414_v43 }
  0x7a   : > { %330 = vadd.xlane.f32.xlu0 %v329_v61  ;;  %v320_v61 = vmul.f32 %v1420_v45, %v1420_v45 }
  0x7b   : > { %v368_v62 = vadd.f32 %v322_v58, %v321_v57  ;;  %v523_v57 = vrot.slane %v509_v49, 4 }
  0x7c   : > { %v365_v63 = vadd.f32 %v320_v61, %v319_v60 }
  0x7d   : > { %339 = vadd.xlane.f32.xlu1 %v338_v3  ;;  %v239_v3 = vld [vmem:[%s1292_s5] sm:$0xff] }
  0x7e   : > { %336 = vadd.xlane.f32.xlu0 %v335_v11  ;;  %v483_v11 = vrot.slane %v239_v3, 4  ;;  %v507_v41 = vmul.f32 %v239_v3, %v239_v3 }
  0x80   : > { %v484_v28 = vadd.f32 %v483_v11, %v239_v3  ;;  %v524_v3 = vadd.f32 %v523_v57, %v509_v49 }
  0x81   : > { %345 = vadd.xlane.f32.xlu1 %v344_v22  ;;  %v495_v22 = vrot.slane %v241_v10, 4 }
  0x82   : > { %342 = vadd.xlane.f32.xlu0 %v341_v29  ;;  %v490_v29 = vadd.f32 %v489_v17, %v240_v7 }
  0x83   : > { %v496_v34 = vadd.f32 %v495_v22, %v241_v10 }
  0x84   : > { %v491_v46 = vrot.slane %v490_v29, 2 }
  0x85   : > { %351 = vadd.xlane.f32.xlu1 %v350_v40  ;;  %v485_v40 = vrot.slane %v484_v28, 2  ;;  %v497_v48 = vrot.slane %v496_v34, 2 }
  0x86   : > { %348 = vadd.xlane.f32.xlu0 %v347_v47  ;;  %v508_v47 = vmul.f32 %v240_v7, %v240_v7  ;;  %v492_v54 = vadd.f32 %v491_v46, %v490_v29 }
  0x87   : > { %v486_v52 = vadd.f32 %v485_v40, %v484_v28  ;;  %v525_v40 = vrot.slane %v524_v3, 2 }
  0x88   : > { %v517_v55 = vrot.slane %v508_v47, 4 }
  0x89   : > { %357 = vadd.xlane.f32.xlu1 %v356_v50  ;;  %v503_v50 = vrot.slane %v502_v35, 2  ;;  %v487_v60 = vrot.slane %v486_v52, 1 }
  0x8a   : > { %354 = vadd.xlane.f32.xlu0 %v353_v53  ;;  %v511_v53 = vrot.slane %v507_v41, 4 }
  0x8b   : > { %v504_v58 = vadd.f32 %v503_v50, %v502_v35  ;;  %v488_v22 = vadd.f32 %v487_v60, %v486_v52 }
  0x8c   : > { %v512_v61 = vadd.f32 %v511_v53, %v507_v41  ;;  %v526_v41 = vadd.f32 %v525_v40, %v524_v3 }
  0x8d   : > { %363 = vadd.xlane.f32.xlu1 %v362_v56  ;;  %v498_v56 = vadd.f32 %v497_v48, %v496_v34  ;;  %v505_v17 = vrot.slane %v504_v58, 1  ;;  %v1494_v48 = vmul.f32 0.125, %v488_v22 }
  0x8e   : > { %360 = vadd.xlane.f32.xlu0 %v359_v59  ;;  %v529_v59 = vrot.slane %v510_v51, 4  ;;  %v513_v10 = vrot.slane %v512_v61, 2 }
  0x8f   : > { %v499_v11 = vrot.slane %v498_v56, 1  ;;  %v506_v29 = vadd.f32 %v505_v17, %v504_v58  ;;  %v539_v52 = vmul.f32 %v1494_v48, %v1494_v48 }
  0x90   : > { %v530_v7 = vadd.f32 %v529_v59, %v510_v51  ;;  %v514_v34 = vadd.f32 %v513_v10, %v512_v61 }
  0x91   : > { %369 = vadd.xlane.f32.xlu1 %v368_v62  ;;  %v493_v62 = vrot.slane %v492_v54, 1  ;;  %v500_v28 = vadd.f32 %v499_v11, %v498_v56  ;;  %v1500_v53 = vmul.f32 0.125, %v506_v29  ;;  %v527_v56 = vrot.slane %v526_v41, 1 }
  0x92   : > { %366 = vadd.xlane.f32.xlu0 %v365_v63  ;;  %v518_v63 = vadd.f32 %v517_v55, %v508_v47  ;;  %v531_v46 = vrot.slane %v530_v7, 2  ;;  %v515_v51 = vrot.slane %v514_v34, 1  ;;  %v543_v61 = vmul.f32 8.0, %v539_v52 }
  0x93   : > { %v494_v23 = vadd.f32 %v493_v62, %v492_v54  ;;  %v1498_v47 = vmul.f32 0.125, %v500_v28  ;;  %v542_v59 = vmul.f32 %v1500_v53, %v1500_v53  ;;  %v528_v11 = vadd.f32 %v527_v56, %v526_v41 }
  0x94   : > { %v519_v16 = vrot.slane %v518_v63, 2  ;;  %v532_v49 = vadd.f32 %v531_v46, %v530_v7  ;;  %v516_v60 = vadd.f32 %v515_v51, %v514_v34 }
  0x95   : > { %v1496_v50 = vmul.f32 0.125, %v494_v23  ;;  %v541_v57 = vmul.f32 %v1498_v47, %v1498_v47  ;;  %v546_v7 = vmul.f32 8.0, %v542_v59 }
  0x96   : > { %v520_v35 = vadd.f32 %v519_v16, %v518_v63  ;;  %v533_v58 = vrot.slane %v532_v49, 1  ;;  %v547_v22 = vsub.f32 %v516_v60, %v543_v61 }
  0x97   : > { %v540_v55 = vmul.f32 %v1496_v50, %v1496_v50  ;;  %v545_v3 = vmul.f32 8.0, %v541_v57 }
  0x98   : > { %v521_v54 = vrot.slane %v520_v35, 1  ;;  %v534_v17 = vadd.f32 %v533_v58, %v532_v49  ;;  %v551_v28 = vmul.f32 0.14285715, %v547_v22 }
  0x99   : > { %v544_v63 = vmul.f32 8.0, %v540_v55  ;;  %v549_v23 = vsub.f32 %v528_v11, %v545_v3 }
  0x9a   : > { %v522_v62 = vadd.f32 %v521_v54, %v520_v35  ;;  %v550_v16 = vsub.f32 %v534_v17, %v546_v7  ;;  %v555_v44 = vmax.f32 %v551_v28, 0.0 }
  0x9b   : > { %v553_v29 = vmul.f32 0.14285715, %v549_v23 }
  0x9c   : > { %v548_v10 = vsub.f32 %v522_v62, %v544_v63  ;;  %v554_v46 = vmul.f32 0.14285715, %v550_v16  ;;  %940 = vrsqrt.f32 %v555_v44  ;;  %vm561_vm0 = vcmp.eq.f32.partialorder %v555_v44, inf }
  0x9d   : > { %v557_v34 = vmax.f32 %v553_v29, 0.0  ;;  %vm563_vm2 = vcmp.eq.f32.partialorder %v555_v44, 0.0  ;;  %v564_v16 = vand.u32 2147483648, %v555_v44 }
  0x9e   : > { %v552_v40 = vmul.f32 0.14285715, %v548_v10  ;;  %v558_v51 = vmax.f32 %v554_v46, 0.0 }
  0x9f   : > { %vm575_vm3 = vcmp.eq.f32.partialorder %v557_v34, inf  ;;  %vm577_vm6 = vcmp.eq.f32.partialorder %v557_v34, 0.0  ;;  %v578_v29 = vand.u32 2147483648, %v557_v34 }
  0xa0   : > { %v556_v42 = vmax.f32 %v552_v40, 0.0  ;;  %vm582_vm4 = vcmp.eq.f32.partialorder %v558_v51, inf  ;;  %v585_v46 = vand.u32 2147483648, %v558_v51  ;;  %vm584_vm7 = vcmp.eq.f32.partialorder %v558_v51, 0.0 }
  0xa2   : > { %942 = vrsqrt.f32 %v556_v42  ;;  %vm568_vm1 = vcmp.eq.f32.partialorder %v556_v42, inf  ;;  %vm570_vm5 = vcmp.eq.f32.partialorder %v556_v42, 0.0  ;;  %v571_v28 = vand.u32 2147483648, %v556_v42 }
  0xa3   : > { %944 = vrsqrt.f32 %v557_v34 }
  0xa4   : > { %946 = vrsqrt.f32 %v558_v51 }
  0xa9   : > { %v941_v57 = vpop.eup %940 }
  0xaa   : > { %v560_v11 = vmul.f32 %v941_v57, %v555_v44 }
  0xac   : > { %v562_v23 = vsel %vm561_vm0, %v555_v44, %v560_v11 }
  0xaf   : > { %v943_v59 = vpop.eup %942 }
  0xb0   : > { %v945_v60 = vpop.eup %944  ;;  %v567_v3 = vmul.f32 %v943_v59, %v556_v42 }
  0xb1   : > { %v947_v61 = vpop.eup %946  ;;  %v574_v17 = vmul.f32 %v945_v60, %v557_v34 }
  0xb2   : > { %v581_v7 = vmul.f32 %v947_v61, %v558_v51  ;;  %v569_v40 = vsel %vm568_vm1, %v556_v42, %v567_v3  ;;  %v1537_v3 = vsel %vm563_vm2, %v564_v16, %v562_v23 }
  0xb3   : > { %v576_v59 = vsel %vm575_vm3, %v557_v34, %v574_v17  ;;  %v1540_v36 = vsel %vm570_vm5, %v571_v28, %v569_v40 }
  0xb4   : > { %v583_v60 = vsel %vm582_vm4, %v558_v51, %v581_v7 }
  0xb5   : > { %v1544_v34 = vsel %vm584_vm7, %v585_v46, %v583_v60 }
  0xde   : > { %v251_v45 = vpop.xlane.xlu1 %250 }
  0xdf   : > { %v245_v43 = vpop.xlane.xlu0 %244  ;;  %v1524_v57 = vmul.f32 0.00390625, %v251_v45  ;;  %v1542_v45 = vsel %vm577_vm6, %v578_v29, %v576_v59 }
  0xe0   : > { %v1526_v61 = vmul.f32 0.00390625, %v245_v43 }
  0xe1   : > { %v405_v44 = vmul.f32 %v1524_v57, %v1524_v57 }
  0xe2   : > { %v254_v35 = vpop.xlane.xlu1 %253  ;;  %v403_v23 = vmul.f32 %v1526_v61, %v1526_v61 }
  0xe3   : > { %v248_v41 = vpop.xlane.xlu0 %247  ;;  %v1530_v38 = vmul.f32 0.00390625, %v254_v35 }
  0xe4   : > { %v1532_v37 = vmul.f32 0.00390625, %v248_v41 }
  0xe5   : > { %v406_v60 = vmul.f32 %v1530_v38, %v1530_v38 }
  0xe6   : > { %v260_v49 = vpop.xlane.xlu1 %259  ;;  %v404_v40 = vmul.f32 %v1532_v37, %v1532_v37 }
  0xe7   : > { %v257_v52 = vpop.xlane.xlu0 %256  ;;  %v1550_v35 = vmul.f32 0.00390625, %v260_v49 }
  0xe8   : > { %v1558_v17 = vmul.f32 0.00390625, %v257_v52 }
  0xe9   : > { %v408_v42 = vmul.f32 %v1550_v35, %v1550_v35 }
  0xea   : > { %v266_v54 = vpop.xlane.xlu1 %265 }
  0xeb   : > { %v1510_v55 = vpop.xlane.xlu0 %262  ;;  %v1570_v52 = vmul.f32 0.00390625, %v266_v54 }
  0xec   : > { %v1583_v54 = vmul.f32 0.00390625, %v1510_v55 }
  0xee   : > { %v1512_v56 = vpop.xlane.xlu1 %271  ;;  %v409_v55 = vmul.f32 %v1583_v54, %v1583_v54 }
  0xef   : > { %v1514_v58 = vpop.xlane.xlu0 %268  ;;  %v1596_v16 = vmul.f32 0.00390625, %v1512_v56 }
  0xf0   : > { %v1603_v51 = vmul.f32 0.00390625, %v1514_v58 }
  0xf2   : > { %v1516_v62 = vpop.xlane.xlu1 %277 }
  0xf3   : > { %v1518_v63 = vpop.xlane.xlu0 %274 }
  0xf6   : > { %v1520_v22 = vpop.xlane.xlu1 %283 }
  0xf7   : > { %v1522_v10 = vpop.xlane.xlu0 %280 }
  0xfa   : > { %v1528_v39 = vpop.xlane.xlu1 %289 }
  0xfb   : > { %v1534_v11 = vpop.xlane.xlu0 %286 }
  0xfe   : > { %v328_v7 = vpop.xlane.xlu1 %327 }
  0xff   : > { %v388_v28 = vmul.f32 0.00390625, %v328_v7  ;;  %v325_v29 = vpop.xlane.xlu0 %324 }
 0x100   : > { %v387_v59 = vmul.f32 0.00390625, %v325_v29 }
 0x101   : > { %v420_v49 = vsub.f32 %v388_v28, %v404_v40  ;;  %v407_v28 = vmul.f32 %v1558_v17, %v1558_v17 }
 0x102   : > { %v419_v29 = vsub.f32 %v387_v59, %v403_v23  ;;  %v334_v41 = vpop.xlane.xlu1 %333 }
 0x103   : > { %v436_v46 = vmax.f32 %v420_v49, 0.0  ;;  %v390_v43 = vmul.f32 0.00390625, %v334_v41  ;;  %v331_v33 = vpop.xlane.xlu0 %330  ;;  %v410_v41 = vmul.f32 %v1570_v52, %v1570_v52 }
 0x104   : > { %v435_v23 = vmax.f32 %v419_v29, 0.0  ;;  %v389_v59 = vmul.f32 0.00390625, %v331_v33 }
 0x105   : > { %v452_v7 = vadd.f32 1e-05, %v436_v46  ;;  %v422_v32 = vsub.f32 %v390_v43, %v406_v60 }
 0x106   : > { %v451_v40 = vadd.f32 1e-05, %v435_v23  ;;  %v421_v31 = vsub.f32 %v389_v59, %v405_v44  ;;  %v340_v30 = vpop.xlane.xlu1 %339 }
 0x107   : > { %948 = vrsqrt.f32 %v452_v7  ;;  %v438_v56 = vmax.f32 %v422_v32, 0.0  ;;  %v392_v29 = vmul.f32 0.00390625, %v340_v30  ;;  %v337_v46 = vpop.xlane.xlu0 %336 }
 0x108   : > { %950 = vrsqrt.f32 %v451_v40  ;;  %v437_v43 = vmax.f32 %v421_v31, 0.0  ;;  %v391_v60 = vmul.f32 0.00390625, %v337_v46  ;;  %v412_v31 = vmul.f32 %v1596_v16, %v1596_v16 }
 0x109   : > { %v454_v23 = vadd.f32 1e-05, %v438_v56  ;;  %v424_v59 = vsub.f32 %v392_v29, %v408_v42  ;;  %v411_v42 = vmul.f32 %v1603_v51, %v1603_v51  ;;  %v1622_v29 = vmul.f32 0.00390625, %v1516_v62 }
 0x10a   : > { %v453_v32 = vadd.f32 1e-05, %v437_v43  ;;  %v423_v30 = vsub.f32 %v391_v60, %v407_v28  ;;  %v346_v33 = vpop.xlane.xlu1 %345  ;;  %v1625_v28 = vmul.f32 0.00390625, %v1518_v63  ;;  %v1628_v40 = vmul.f32 0.00390625, %v1520_v22 }
 0x10b   : > { %952 = vrsqrt.f32 %v454_v23  ;;  %v440_v46 = vmax.f32 %v424_v59, 0.0  ;;  %v394_v58 = vmul.f32 0.00390625, %v346_v33  ;;  %v343_v49 = vpop.xlane.xlu0 %342  ;;  %v1631_v33 = vmul.f32 0.00390625, %v1522_v10 }
 0x10c   : > { %954 = vrsqrt.f32 %v453_v32  ;;  %v439_v44 = vmax.f32 %v423_v30, 0.0  ;;  %v393_v56 = vmul.f32 0.00390625, %v343_v49  ;;  %1943 = vst [vmem:[#allocation23_spill] sm:$0xff] %v1625_v28  ;;  %1944 = vst [vmem:[#allocation24_spill] sm:$0xff] %v1628_v40  ;;  %v1634_v32 = vmul.f32 0.00390625, %v1528_v39 }
 0x10d   : > { %v456_v43 = vadd.f32 1e-05, %v440_v46  ;;  %v426_v60 = vsub.f32 %v394_v58, %v410_v41  ;;  %1945 = vst [vmem:[#allocation25_spill] sm:$0xff] %v1631_v33  ;;  %v1637_v63 = vmul.f32 0.00390625, %v1534_v11  ;;  %v414_v10 = vmul.f32 %v1622_v29, %v1622_v29 }
 0x10e   : > { %v455_v23 = vadd.f32 1e-05, %v439_v44  ;;  %v425_v59 = vsub.f32 %v393_v56, %v409_v55  ;;  %v352_v49 = vpop.xlane.xlu1 %351  ;;  %1946 = vst [vmem:[#allocation26_spill] sm:$0xff] %v1634_v32  ;;  %v413_v55 = vmul.f32 %v1625_v28, %v1625_v28  ;;  %v1649_v11 = vmul.f32 %v1631_v33, %v1631_v33 }
 0x10f   : > { %956 = vrsqrt.f32 %v456_v43  ;;  %v442_v62 = vmax.f32 %v426_v60, 0.0  ;;  %v396_v30 = vmul.f32 0.00390625, %v352_v49  ;;  %v349_v7 = vpop.xlane.xlu0 %348  ;;  %1947 = vst [vmem:[#allocation27_spill] sm:$0xff] %v1637_v63  ;;  %v1645_v43 = vmul.f32 %v1628_v40, %v1628_v40 }
 0x110   : > { %958 = vrsqrt.f32 %v455_v23  ;;  %v441_v41 = vmax.f32 %v425_v59, 0.0  ;;  %v395_v22 = vmul.f32 0.00390625, %v349_v7  ;;  %v1653_v23 = vmul.f32 %v1634_v32, %v1634_v32 }
 0x111   : > { %v458_v58 = vadd.f32 1e-05, %v442_v62  ;;  %v428_v46 = vsub.f32 %v396_v30, %v412_v31  ;;  %v1657_v62 = vmul.f32 %v1637_v63, %v1637_v63 }
 0x112   : > { %v457_v39 = vadd.f32 1e-05, %v441_v41  ;;  %v427_v44 = vsub.f32 %v395_v22, %v411_v42  ;;  %v358_v56 = vpop.xlane.xlu1 %357  ;;  %v1948_v41 = vsub.f32 %v1321_v8, %v1532_v37 }
 0x113   : > { %960 = vrsqrt.f32 %v458_v58  ;;  %v444_v7 = vmax.f32 %v428_v46, 0.0  ;;  %v398_v31 = vmul.f32 0.00390625, %v358_v56  ;;  %v355_v60 = vpop.xlane.xlu0 %354  ;;  %v1949_v58 = vsub.f32 %v1324_v9, %v1532_v37 }
 0x114   : > { %v949_v59 = vpop.eup %948  ;;  %962 = vrsqrt.f32 %v457_v39  ;;  %v443_v42 = vmax.f32 %v427_v44, 0.0  ;;  %v397_v49 = vmul.f32 0.00390625, %v355_v60  ;;  %v1950_v39 = vsub.f32 %v1305_v2, %v1526_v61 }
 0x115   : > { %v951_v30 = vpop.eup %950  ;;  %v621_v22 = vmul.f32 %v949_v59, %v1948_v41  ;;  %v622_v46 = vmul.f32 %v949_v59, %v1949_v58  ;;  %v460_v56 = vadd.f32 1e-05, %v444_v7  ;;  %v430_v32 = vsub.f32 %v398_v31, %v414_v10 }
 0x116   : > { %v619_v44 = vmul.f32 %v951_v30, %v1950_v39  ;;  %v1951_v60 = vsub.f32 %v1310_v4, %v1526_v61  ;;  %v459_v33 = vadd.f32 1e-05, %v443_v42  ;;  %v429_v40 = vsub.f32 %v397_v49, %v413_v55  ;;  %v364_v42 = vpop.xlane.xlu1 %363 }
 0x117   : > { %v653_v28 = vmul.f32 %v621_v22, %v1537_v3  ;;  %v654_v8 = vmul.f32 %v622_v46, %v1540_v36  ;;  %964 = vrsqrt.f32 %v460_v56  ;;  %v446_v41 = vmax.f32 %v430_v32, 0.0  ;;  %v361_v49 = vpop.xlane.xlu0 %360 }
 0x118   : > { %v620_v63 = vmul.f32 %v951_v30, %v1951_v60  ;;  %v953_v9 = vpop.eup %952  ;;  %v651_v37 = vmul.f32 %v619_v44, %v1537_v3  ;;  %966 = vrsqrt.f32 %v459_v33  ;;  %v445_v2 = vmax.f32 %v429_v40, 0.0 }
 0x119   : > { %v955_v7 = vpop.eup %954  ;;  %v685_v4 = vadd.f32 %v653_v28, %v1494_v48  ;;  %v686_v61 = vadd.f32 %v654_v8, %v1496_v50  ;;  %v1952_v55 = vsub.f32 %v1313_v5, %v1530_v38  ;;  %v1953_v32 = vsub.f32 %v1316_v6, %v1530_v38 }
 0x11a   : > { %v652_v10 = vmul.f32 %v620_v63, %v1540_v36  ;;  %v683_v30 = vadd.f32 %v651_v37, %v1494_v48  ;;  %v1954_v40 = vsub.f32 %v1299_v0, %v1524_v57  ;;  %v1955_v63 = vsub.f32 %v1302_v1, %v1524_v57 }
 0x11b   : > { %v625_v31 = vmul.f32 %v953_v9, %v1952_v55  ;;  %v626_v59 = vmul.f32 %v953_v9, %v1953_v32  ;;  %717 = vst [vmem:[%s1693_s20 + $0x10] sm:$0xff] %v685_v4  ;;  %718 = vst [vmem:[%s1693_s20 + $0x18] sm:$0xff] %v686_v61  ;;  %v462_v38 = vadd.f32 1e-05, %v446_v41  ;;  %v461_v0 = vadd.f32 1e-05, %v445_v2 }
 0x11c   : > { %v684_v33 = vadd.f32 %v652_v10, %v1496_v50  ;;  %v623_v28 = vmul.f32 %v955_v7, %v1954_v40  ;;  %v624_v22 = vmul.f32 %v955_v7, %v1955_v63  ;;  %v957_v58 = vpop.eup %956  ;;  %715 = vst [vmem:[%s1693_s20] sm:$0xff] %v683_v30  ;;  %v400_v46 = vmul.f32 0.00390625, %v364_v42  ;;  %v370_v40 = vpop.xlane.xlu1 %369 }
 0x11d   : > { %v657_v5 = vmul.f32 %v625_v31, %v1537_v3  ;;  %v658_v6 = vmul.f32 %v626_v59, %v1540_v36  ;;  %v399_v56 = vmul.f32 0.00390625, %v361_v49  ;;  %v959_v39 = vpop.eup %958  ;;  %v1956_v8 = vsub.f32 %v1331_v12, %v1550_v35 }
 0x11e   : > { %716 = vst [vmem:[%s1693_s20 + $0x8] sm:$0xff] %v684_v33  ;;  %v655_v1 = vmul.f32 %v623_v28, %v1537_v3  ;;  %v656_v57 = vmul.f32 %v624_v22, %v1540_v36  ;;  %v1957_v9 = vsub.f32 %v1334_v13, %v1550_v35  ;;  %v1958_v7 = vsub.f32 %v1337_v14, %v1558_v17  ;;  %v367_v28 = vpop.xlane.xlu0 %366 }
 0x11f   : > { %v689_v44 = vadd.f32 %v657_v5, %v1494_v48  ;;  %v690_v60 = vadd.f32 %v658_v6, %v1496_v50  ;;  %v629_v41 = vmul.f32 %v957_v58, %v1956_v8  ;;  %v1959_v61 = vsub.f32 %v1340_v15, %v1558_v17 }
 0x120   : > { %v630_v37 = vmul.f32 %v957_v58, %v1957_v9  ;;  %v687_v10 = vadd.f32 %v655_v1, %v1494_v48  ;;  %v688_v2 = vadd.f32 %v656_v57, %v1496_v50  ;;  %v627_v4 = vmul.f32 %v959_v39, %v1958_v7  ;;  %v961_v35 = vpop.eup %960 }
 0x121   : > { %v628_v55 = vmul.f32 %v959_v39, %v1959_v61  ;;  %721 = vst [vmem:[%s1693_s20 + $0x30] sm:$0xff] %v689_v44  ;;  %722 = vst [vmem:[%s1693_s20 + $0x38] sm:$0xff] %v690_v60  ;;  %v661_v12 = vmul.f32 %v629_v41, %v1537_v3  ;;  %968 = vrsqrt.f32 %v462_v38  ;;  %v432_v13 = vsub.f32 %v400_v46, %v1645_v43  ;;  %v963_v17 = vpop.eup %962 }
 0x122   : > { %v662_v31 = vmul.f32 %v630_v37, %v1540_v36  ;;  %719 = vst [vmem:[%s1693_s20 + $0x20] sm:$0xff] %v687_v10  ;;  %720 = vst [vmem:[%s1693_s20 + $0x28] sm:$0xff] %v688_v2  ;;  %v659_v14 = vmul.f32 %v627_v4, %v1537_v3  ;;  %970 = vrsqrt.f32 %v461_v0  ;;  %v431_v15 = vsub.f32 %v399_v56, %v1649_v11 }
 0x123   : > { %v660_v32 = vmul.f32 %v628_v55, %v1540_v36  ;;  %v693_v59 = vadd.f32 %v661_v12, %v1494_v48  ;;  %v1960_v43 = vsub.f32 %v1347_v18, %v1570_v52  ;;  %v1961_v30 = vsub.f32 %v1350_v19, %v1570_v52  ;;  %v1968_v12 = vld [vmem:[#allocation11_spill] sm:$0xff] }
 0x124   : > { %v694_v42 = vadd.f32 %v662_v31, %v1496_v50  ;;  %v691_v63 = vadd.f32 %v659_v14, %v1494_v48  ;;  %v1962_v22 = vsub.f32 %v1353_v20, %v1583_v54  ;;  %v1963_v18 = vsub.f32 %v1356_v21, %v1583_v54  ;;  %v965_v58 = vpop.eup %964  ;;  %v1970_v14 = vld [vmem:[#allocation23_spill] sm:$0xff] }
 0x125   : > { %v633_v49 = vmul.f32 %v961_v35, %v1960_v43  ;;  %v634_v33 = vmul.f32 %v961_v35, %v1961_v30  ;;  %v692_v11 = vadd.f32 %v660_v32, %v1496_v50  ;;  %725 = vst [vmem:[%s1693_s20 + $0x50] sm:$0xff] %v693_v59  ;;  %v448_v38 = vmax.f32 %v432_v13, 0.0  ;;  %v967_v54 = vpop.eup %966  ;;  %v1971_v32 = vld [vmem:[#allocation13_spill] sm:$0xff] }
 0x126   : > { %v631_v5 = vmul.f32 %v963_v17, %v1962_v22  ;;  %v632_v6 = vmul.f32 %v963_v17, %v1963_v18  ;;  %726 = vst [vmem:[%s1693_s20 + $0x58] sm:$0xff] %v694_v42  ;;  %v447_v0 = vmax.f32 %v431_v15, 0.0  ;;  %723 = vst [vmem:[%s1693_s20 + $0x40] sm:$0xff] %v691_v63  ;;  %v402_v57 = vmul.f32 0.00390625, %v370_v40  ;;  %v1972_v17 = vld [vmem:[#allocation14_spill] sm:$0xff] }
 0x127   : > { %v665_v19 = vmul.f32 %v633_v49, %v1537_v3  ;;  %v666_v52 = vmul.f32 %v634_v33, %v1540_v36  ;;  %724 = vst [vmem:[%s1693_s20 + $0x48] sm:$0xff] %v692_v11  ;;  %v401_v21 = vmul.f32 0.00390625, %v367_v28  ;;  %v1964_v39 = vsub.f32 %v1363_v24, %v1596_v16 }
 0x128   : > { %v663_v20 = vmul.f32 %v631_v5, %v1537_v3  ;;  %v664_v1 = vmul.f32 %v632_v6, %v1540_v36  ;;  %v1965_v60 = vsub.f32 %v1366_v25, %v1596_v16  ;;  %v1966_v41 = vsub.f32 %v1369_v26, %v1603_v51 }
 0x129   : > { %v697_v46 = vadd.f32 %v665_v19, %v1494_v48  ;;  %v698_v56 = vadd.f32 %v666_v52, %v1496_v50  ;;  %v637_v44 = vmul.f32 %v965_v58, %v1964_v39  ;;  %v1967_v37 = vsub.f32 %v1372_v27, %v1603_v51  ;;  %v1973_v52 = vld [vmem:[#allocation24_spill] sm:$0xff] }
 0x12a   : > { %v638_v8 = vmul.f32 %v965_v58, %v1965_v60  ;;  %v695_v3 = vadd.f32 %v663_v20, %v1494_v48  ;;  %v696_v36 = vadd.f32 %v664_v1, %v1496_v50  ;;  %v635_v9 = vmul.f32 %v967_v54, %v1966_v41  ;;  %v1975_v58 = vld [vmem:[#allocation16_spill] sm:$0xff] }
 0x12b   : > { %v636_v10 = vmul.f32 %v967_v54, %v1967_v37  ;;  %729 = vst [vmem:[%s1693_s20 + $0x70] sm:$0xff] %v697_v46  ;;  %730 = vst [vmem:[%s1693_s20 + $0x78] sm:$0xff] %v698_v56  ;;  %v669_v24 = vmul.f32 %v637_v44, %v1542_v45  ;;  %v464_v25 = vadd.f32 1e-05, %v448_v38  ;;  %v463_v16 = vadd.f32 1e-05, %v447_v0 }
 0x12c   : > { %v670_v2 = vmul.f32 %v638_v8, %v1544_v34  ;;  %727 = vst [vmem:[%s1693_s20 + $0x60] sm:$0xff] %v695_v3  ;;  %728 = vst [vmem:[%s1693_s20 + $0x68] sm:$0xff] %v696_v36  ;;  %v667_v48 = vmul.f32 %v635_v9, %v1542_v45  ;;  %v434_v50 = vsub.f32 %v402_v57, %v1653_v23  ;;  %v1969_v23 = vld [vmem:[#allocation12_spill] sm:$0xff]  ;;  %v1974_v38 = vld [vmem:[#allocation15_spill] sm:$0xff] }
 0x12d   : > { %v668_v26 = vmul.f32 %v636_v10, %v1544_v34  ;;  %v433_v27 = vsub.f32 %v401_v21, %v1657_v62  ;;  %v701_v51 = vadd.f32 %v669_v24, %v1498_v47  ;;  %972 = vrsqrt.f32 %v464_v25  ;;  %v1976_v57 = vld [vmem:[#allocation25_spill] sm:$0xff]  ;;  %v1978_v46 = vld [vmem:[#allocation18_spill] sm:$0xff]  ;;  %v1980_v37 = vld [vmem:[#allocation19_spill] sm:$0xff] }
 0x12e   : > { %v702_v7 = vadd.f32 %v670_v2, %v1500_v53  ;;  %v699_v4 = vadd.f32 %v667_v48, %v1498_v47  ;;  %974 = vrsqrt.f32 %v463_v16  ;;  %v450_v55 = vmax.f32 %v434_v50, 0.0  ;;  %v969_v35 = vpop.eup %968  ;;  %v1977_v21 = vld [vmem:[#allocation17_spill] sm:$0xff]  ;;  %v1979_v9 = vld [vmem:[#allocation26_spill] sm:$0xff]  ;;  %v1981_v24 = vld [vmem:[#allocation20_spill] sm:$0xff] }
 0x12f   : > { %v700_v61 = vadd.f32 %v668_v26, %v1500_v53  ;;  %v609_v31 = vsub.f32 %v1968_v12, %v1622_v29  ;;  %v610_v13 = vsub.f32 %v1969_v23, %v1622_v29  ;;  %733 = vst [vmem:[%s1693_s20 + $0x90] sm:$0xff] %v701_v51  ;;  %v449_v62 = vmax.f32 %v433_v27, 0.0  ;;  %v971_v43 = vpop.eup %970  ;;  %v1982_v26 = vld [vmem:[#allocation27_spill] sm:$0xff]  ;;  %v1983_v50 = vld [vmem:[#allocation21_spill] sm:$0xff]  ;;  %v1984_v51 = vld [vmem:[#allocation22_spill] sm:$0xff] }
 0x130   : > { %734 = vst [vmem:[%s1693_s20 + $0x98] sm:$0xff] %v702_v7  ;;  %v607_v15 = vsub.f32 %v1971_v32, %v1970_v14  ;;  %v608_v59 = vsub.f32 %v1972_v17, %v1970_v14  ;;  %731 = vst [vmem:[%s1693_s20 + $0x80] sm:$0xff] %v699_v4  ;;  %v466_v42 = vadd.f32 1e-05, %v450_v55  ;;  %v613_v0 = vsub.f32 %v1974_v38, %v1973_v52 }
 0x131   : > { %732 = vst [vmem:[%s1693_s20 + $0x88] sm:$0xff] %v700_v61  ;;  %v641_v49 = vmul.f32 %v969_v35, %v609_v31  ;;  %v642_v30 = vmul.f32 %v969_v35, %v610_v13  ;;  %v465_v29 = vadd.f32 1e-05, %v449_v62  ;;  %v614_v20 = vsub.f32 %v1975_v58, %v1973_v52 }
 0x132   : > { %v639_v33 = vmul.f32 %v971_v43, %v607_v15  ;;  %v640_v40 = vmul.f32 %v971_v43, %v608_v59  ;;  %976 = vrsqrt.f32 %v466_v42  ;;  %v611_v54 = vsub.f32 %v1977_v21, %v1976_v57 }
 0x133   : > { %v673_v28 = vmul.f32 %v641_v49, %v1542_v45  ;;  %v674_v63 = vmul.f32 %v642_v30, %v1544_v34  ;;  %978 = vrsqrt.f32 %v465_v29  ;;  %v612_v56 = vsub.f32 %v1978_v46, %v1976_v57 }
 0x134   : > { %v671_v11 = vmul.f32 %v639_v33, %v1542_v45  ;;  %v672_v22 = vmul.f32 %v640_v40, %v1544_v34  ;;  %v617_v10 = vsub.f32 %v1980_v37, %v1979_v9  ;;  %v618_v2 = vsub.f32 %v1981_v24, %v1979_v9 }
 0x135   : > { %v705_v5 = vadd.f32 %v673_v28, %v1498_v47  ;;  %v706_v18 = vadd.f32 %v674_v63, %v1500_v53  ;;  %v615_v27 = vsub.f32 %v1983_v50, %v1982_v26  ;;  %v616_v7 = vsub.f32 %v1984_v51, %v1982_v26 }
 0x136   : > { %v703_v6 = vadd.f32 %v671_v11, %v1498_v47  ;;  %v704_v19 = vadd.f32 %v672_v22, %v1500_v53 }
 0x137   : > { %737 = vst [vmem:[%s1693_s20 + $0xb0] sm:$0xff] %v705_v5  ;;  %738 = vst [vmem:[%s1693_s20 + $0xb8] sm:$0xff] %v706_v18 }
 0x138   : > { %735 = vst [vmem:[%s1693_s20 + $0xa0] sm:$0xff] %v703_v6  ;;  %736 = vst [vmem:[%s1693_s20 + $0xa8] sm:$0xff] %v704_v19 }
 0x13a   : > { %v973_v1 = vpop.eup %972 }
 0x13b   : > { %v975_v39 = vpop.eup %974  ;;  %v645_v44 = vmul.f32 %v973_v1, %v613_v0  ;;  %v646_v60 = vmul.f32 %v973_v1, %v614_v20 }
 0x13c   : > { %v643_v8 = vmul.f32 %v975_v39, %v611_v54  ;;  %v644_v3 = vmul.f32 %v975_v39, %v612_v56 }
 0x13d   : > { %v677_v36 = vmul.f32 %v645_v44, %v1542_v45  ;;  %v678_v41 = vmul.f32 %v646_v60, %v1544_v34 }
 0x13e   : > { %v675_v25 = vmul.f32 %v643_v8, %v1542_v45  ;;  %v676_v16 = vmul.f32 %v644_v3, %v1544_v34 }
 0x13f   : > { %v977_v48 = vpop.eup %976  ;;  %v709_v4 = vadd.f32 %v677_v36, %v1498_v47  ;;  %v710_v61 = vadd.f32 %v678_v41, %v1500_v53 }
 0x140   : > { %v979_v55 = vpop.eup %978  ;;  %v707_v12 = vadd.f32 %v675_v25, %v1498_v47  ;;  %v708_v31 = vadd.f32 %v676_v16, %v1500_v53  ;;  %v649_v23 = vmul.f32 %v977_v48, %v617_v10  ;;  %v650_v13 = vmul.f32 %v977_v48, %v618_v2 }
 0x141   : > { %741 = vst [vmem:[%s1693_s20 + $0xd0] sm:$0xff] %v709_v4  ;;  %742 = vst [vmem:[%s1693_s20 + $0xd8] sm:$0xff] %v710_v61  ;;  %v647_v62 = vmul.f32 %v979_v55, %v615_v27  ;;  %v648_v35 = vmul.f32 %v979_v55, %v616_v7 }
 0x142   : > { %739 = vst [vmem:[%s1693_s20 + $0xc0] sm:$0xff] %v707_v12  ;;  %740 = vst [vmem:[%s1693_s20 + $0xc8] sm:$0xff] %v708_v31  ;;  %v681_v14 = vmul.f32 %v649_v23, %v1542_v45  ;;  %v682_v32 = vmul.f32 %v650_v13, %v1544_v34 }
 0x143   : > { %v679_v15 = vmul.f32 %v647_v62, %v1542_v45  ;;  %v680_v17 = vmul.f32 %v648_v35, %v1544_v34 }
 0x144   : > { %v713_v59 = vadd.f32 %v681_v14, %v1498_v47  ;;  %v714_v42 = vadd.f32 %v682_v32, %v1500_v53 }
 0x145   : > { %v711_v43 = vadd.f32 %v679_v15, %v1498_v47  ;;  %v712_v45 = vadd.f32 %v680_v17, %v1500_v53 }
 0x146   : > { %745 = vst [vmem:[%s1693_s20 + $0xf0] sm:$0xff] %v713_v59  ;;  %746 = vst [vmem:[%s1693_s20 + $0xf8] sm:$0xff] %v714_v42 }
 0x147   : > { %743 = vst [vmem:[%s1693_s20 + $0xe0] sm:$0xff] %v711_v43  ;;  %744 = vst [vmem:[%s1693_s20 + $0xe8] sm:$0xff] %v712_v45 }
 0x148   : > { %1049 = shalt.err (!%p1046_p4)
}
 0x149   : > { %s1050_s7 = scalar_lea.hbm %s1846_s19, 4096  ;;  %s1054_s4 = scalar_lea.hbm %s1899_s2, 8192 }
 0x14a   : > { %p1051_p9 = scmp.ne.s32.totalorder %s1846_s19, %s1050_s7  ;;  %p1055_p5 = scmp.lt.s32.totalorder %s1846_s19, %s1899_s2 }
 0x14b   : > { %p1056_p8 = scmp.lt.s32.totalorder %s1054_s4, %s1050_s7 }
 0x14c   : > { %p1052_p11 = pnand %p1051_p9, %p1985_p1 }
 0x14d   : > { %p1057_p6 = por %p1056_p8, %p1055_p5 }
 0x14e   : > { %p1053_p3 = pneg %p1052_p11 }
 0x150   : > { %p1058_p13 = pnand %p1057_p6, %p1053_p3 }
 0x152   : > { %1061 = shalt.err (!%p1058_p13)
}
 0x153   : > { %s1111_s27 = smov 256   ;;  %s1112_s5 = smov 16  }
 0x154   : > { %889 = dma.vmem_to_hbm [thread:$0]  (%p1985_p1), %s1848_s17, 4096, %s1846_s19, %s748_s24, %s1111_s27, %s1111_s27, %s1112_s5  }
 0x155 PF: > { %s777_s20 = sand.u32 1, %s1092_s9   ;;  %p1986_p12 = scmp.ne.s32.totalorder %s1927_s22, 0 }
 0x156   : > { %p1987_p7 = scmp.ge.s32.totalorder %s1104_s12, 2  ;;  %s778_s8 = scalar_lea.sflag [#allocation4], %s777_s20 }
 0x158   : > { %p899_p10 = pnand %p1987_p7, %p1986_p12 }
 0x15a   : > { %p900_p0 = pneg %p899_p10 }
 0x15c   : > { %1087 = dma.done.wait (%p900_p0), %s778_s8, 4096  }
 0x15d   : > { %1089 = vsyncadd (%p900_p0), %s778_s8, 4294963200  ;;  %p18_p2 = scmp.ge.s32.totalorder %s1153_s15, 4   ;;  %s1988_s9 = smov %s1096_s10 }
 0x15e   : > { %s1989_s10 = smov %s1100_s11  ;;  %s1990_s11 = smov %s1165_s18 }
 0x15f   : > { %s1991_s12 = smov %s1153_s15  ;;  %20 = sbr.rel (!%p18_p2) target bundleno = 7 (0x7), region = 86 }
 0x164   :  { %783 = vsyncpa [#allocation3], 1 }
 0x165   :  { %785 = vsyncpa [#allocation3 + $0x1], 1 }
 0x166   :  { %786 = vsyncpa [#allocation6], 1 }
 0x167   :  { %788 = vsyncpa [#allocation6 + $0x1], 1 }
 0x168   :  { %789 = vsyncpa [#allocation4], 1 }
 0x169   :  { %791 = vsyncpa [#allocation4 + $0x1], 1 }

</bundles_post_ra>
